<compile_context>
chip_gen: v7x
topology: tpu7x:2x2x1
jax: 0.10.0
libtpu: 0.0.40
codegen_flags: <defaults>
</compile_context>

<pallas_src>
import functools

import jax
import jax.numpy as jnp
from jax.experimental import pallas as pl
from jax.experimental.pallas import tpu as pltpu


def _soft_ce_kernel(yhat_ref, y_ref, out_ref, *, tile_rows, sub, rows_total):
    """One row-tile of (N, C): emit an (sub, C) per-class partial of sum_n(-y*logp)."""
    x = yhat_ref[...].astype(jnp.float32)                       # (TM, C)
    # numerically-stable log_softmax along the last (lane) axis
    m = jnp.max(x, axis=-1, keepdims=True)
    s = x - m
    lse = jnp.log(jnp.sum(jnp.exp(s), axis=-1, keepdims=True))
    logp = s - lse                                              # (TM, C)

    contrib = -y_ref[...].astype(jnp.float32) * logp            # (TM, C)

    # Mask the tail tile's out-of-bounds rows (trace-time guarded: free when N | TM).
    if rows_total % tile_rows != 0:
        i = pl.program_id(0)
        row_ids = jax.lax.broadcasted_iota(jnp.int32, contrib.shape, 0) + i * tile_rows
        contrib = jnp.where(row_ids < rows_total, contrib, 0.0)

    c = contrib.shape[-1]
    # Reduce rows with plain VPU vreg adds (sublane-aligned groups), no XLU in the
    # hot loop and no serializing scalar accumulator.
    out_ref[...] = jnp.sum(contrib.reshape(tile_rows // sub, sub, c), axis=0)


def _choose_tile_rows(n, c, itemsize, *, vmem_budget_bytes=20 * 1024 * 1024, cap=2048):
    """Pick the largest 8-aligned row tile whose double-buffered stream + f32 temps
    fit comfortably inside the scoped-VMEM budget (conservative for v7x's 64 MiB)."""
    if n <= 8:
        return n
    # 2 inputs x 2 pipeline buffers of the streamed dtype + ~3 f32 temporaries per row.
    per_row_bytes = c * (4 * itemsize + 12)
    t = vmem_budget_bytes // max(per_row_bytes, 1)
    t = max(8, min(cap, t))
    t = min(t, (n // 8) * 8)
    return (t // 8) * 8


def soft_cross_entropy_with_weights(y_hat, y, weights, *, tile_rows=None):
    """y_hat, y: (N, C) float32/bfloat16; weights: (C,). Returns scalar float32 loss."""
    n, c = y_hat.shape
    assert y.shape == (n, c)
    assert weights.shape == (c,)

    itemsize = jnp.dtype(y_hat.dtype).itemsize
    if tile_rows is None:
        tile_rows = _choose_tile_rows(n, c, itemsize)
    else:
        tile_rows = min(int(tile_rows), n)
        if n >= 8:
            tile_rows = max(8, (tile_rows // 8) * 8)

    sub = 8 if tile_rows % 8 == 0 else tile_rows       # rows of the per-tile partial
    num_tiles = pl.cdiv(n, tile_rows)

    kernel = functools.partial(
        _soft_ce_kernel, tile_rows=tile_rows, sub=sub, rows_total=n
    )

    partials = pl.pallas_call(
        kernel,
        out_shape=jax.ShapeDtypeStruct((num_tiles * sub, c), jnp.float32),
        grid_spec=pltpu.PrefetchScalarGridSpec(
            num_scalar_prefetch=0,
            grid=(num_tiles,),
            in_specs=[
                pl.BlockSpec((tile_rows, c), lambda i: (i, 0)),  # y_hat tile
                pl.BlockSpec((tile_rows, c), lambda i: (i, 0)),  # y tile
            ],
            out_specs=pl.BlockSpec((sub, c), lambda i: (i, 0)),  # per-tile partial
        ),
        compiler_params=pltpu.CompilerParams(
            # Each grid step owns its own output block -> parallel (both TCs on v7x).
            dimension_semantics=("parallel",),
            vmem_limit_bytes=32 * 1024 * 1024,
        ),
    )(y_hat, y)

    # Tiny epilogue in XLA: collapse partials, apply class weights, normalize.
    w = weights.astype(jnp.float32)
    per_class = jnp.sum(partials, axis=0)                        # (C,)
    return jnp.sum(per_class * w) / (jnp.sum(w) * jnp.float32(c))


def _reference(y_hat, y, weights):
    logp = jax.nn.log_softmax(y_hat.astype(jnp.float32), axis=-1)
    weighted_logits = logp * weights.astype(jnp.float32)
    weighted_sum = (
        jnp.sum(-y.astype(jnp.float32) * weighted_logits, axis=0) / jnp.sum(weights.astype(jnp.float32))
    )
    return jnp.mean(weighted_sum)


if __name__ == "__main__":
    key = jax.random.PRNGKey(0)
    k1, k2, k3, k4, k5 = jax.random.split(key, 5)

    # --- Test 1: small aligned shapes, single large tile -------------------------
    N, C = 64, 128
    y_hat = jax.random.normal(k1, (N, C), dtype=jnp.float32)
    y = jax.nn.softmax(jax.random.normal(k2, (N, C), dtype=jnp.float32), axis=-1)
    weights = jax.random.uniform(k3, (C,), dtype=jnp.float32, minval=0.5, maxval=1.5)

    loss = jax.block_until_ready(soft_cross_entropy_with_weights(y_hat, y, weights))
    ref = _reference(y_hat, y, weights)
    assert jnp.allclose(loss, ref, rtol=1e-5, atol=1e-5), (loss, ref)

    # --- Test 2: multi-tile parallel grid (explicit tile_rows) -------------------
    loss2 = jax.block_until_ready(
        soft_cross_entropy_with_weights(y_hat, y, weights, tile_rows=16)
    )
    assert jnp.allclose(loss2, ref, rtol=1e-5, atol=1e-5), (loss2, ref)

    # --- Test 3: ragged N (tail masking) + bf16 streaming ------------------------
    N3 = 50
    y_hat3 = jax.random.normal(k4, (N3, C), dtype=jnp.float32).astype(jnp.bfloat16)
    y3 = jax.nn.softmax(
        jax.random.normal(k5, (N3, C), dtype=jnp.float32), axis=-1
    ).astype(jnp.bfloat16)
    loss3 = jax.block_until_ready(soft_cross_entropy_with_weights(y_hat3, y3, weights))
    ref3 = _reference(y_hat3, y3, weights)
    assert jnp.allclose(loss3, ref3, rtol=2e-5, atol=2e-5), (loss3, ref3)

    print("KERNEL_OK")
</pallas_src>

<mosaic_0001>
module attributes {stable_mosaic.version = 11 : i64} {
  func.func @_soft_ce_kernel(%arg0: i32, %arg1: memref<64x128xf32, #tpu.memory_space<vmem>>, %arg2: memref<64x128xf32, #tpu.memory_space<vmem>>, %arg3: memref<8x128xf32, #tpu.memory_space<vmem>>) attributes {dimension_semantics = [#tpu.dimension_semantics<parallel>], iteration_bounds = array<i64: 1>, scalar_prefetch = 0 : i64, scratch_operands = 0 : i64, tpu.core_type = #tpu.core_type<tc>, window_params = [{transform_indices = @transform_0, window_bounds = array<i64: 64, 128>}, {transform_indices = @transform_1, window_bounds = array<i64: 64, 128>}, {transform_indices = @transform_2, window_bounds = array<i64: 8, 128>}]} {
    %c0 = arith.constant 0 : index
    %c0_0 = arith.constant 0 : index
    %0 = vector.load %arg1[%c0, %c0_0] : memref<64x128xf32, #tpu.memory_space<vmem>>, vector<64x128xf32>
    %cst = arith.constant dense<0xFF800000> : vector<64xf32>
    %1 = vector.multi_reduction <maximumf>, %0, %cst [1] : vector<64x128xf32> to vector<64xf32>
    %2 = vector.shape_cast %1 : vector<64xf32> to vector<64x1xf32>
    %3 = vector.broadcast %2 : vector<64x1xf32> to vector<64x128xf32>
    %4 = arith.subf %0, %3 : vector<64x128xf32>
    %5 = math.exp %4 : vector<64x128xf32>
    %cst_1 = arith.constant dense<0.000000e+00> : vector<64xf32>
    %6 = vector.multi_reduction <add>, %5, %cst_1 [1] : vector<64x128xf32> to vector<64xf32>
    %7 = vector.shape_cast %6 : vector<64xf32> to vector<64x1xf32>
    %8 = math.log %7 : vector<64x1xf32>
    %9 = vector.broadcast %8 : vector<64x1xf32> to vector<64x128xf32>
    %10 = arith.subf %4, %9 : vector<64x128xf32>
    %c0_2 = arith.constant 0 : index
    %c0_3 = arith.constant 0 : index
    %11 = vector.load %arg2[%c0_2, %c0_3] : memref<64x128xf32, #tpu.memory_space<vmem>>, vector<64x128xf32>
    %cst_4 = arith.constant 0.000000e+00 : f32
    %12 = vector.broadcast %cst_4 : f32 to vector<64x128xf32>
    %13 = arith.subf %12, %11 : vector<64x128xf32>
    %14 = arith.mulf %13, %10 : vector<64x128xf32>
    %15 = vector.shape_cast %14 : vector<64x128xf32> to vector<8x8x128xf32>
    %cst_5 = arith.constant dense<0.000000e+00> : vector<8x128xf32>
    %16 = vector.multi_reduction <add>, %15, %cst_5 [0] : vector<8x8x128xf32> to vector<8x128xf32>
    %c0_6 = arith.constant 0 : index
    %c0_7 = arith.constant 0 : index
    %17 = vector.load %arg3[%c0_6, %c0_7] : memref<8x128xf32, #tpu.memory_space<vmem>>, vector<8x128xf32>
    tpu.vector_store %arg3[%c0_6, %c0_7], %16 {strides = array<i32>} : memref<8x128xf32, #tpu.memory_space<vmem>>, vector<8x128xf32>,
    return
  }
  func.func @transform_0(%arg0: i32) -> (i32, i32) {
    %c0_i32 = arith.constant 0 : i32
    %c0_i32_0 = arith.constant 0 : i32
    return %arg0, %c0_i32 : i32, i32
  }
  func.func @transform_1(%arg0: i32) -> (i32, i32) {
    %c0_i32 = arith.constant 0 : i32
    %c0_i32_0 = arith.constant 0 : i32
    return %arg0, %c0_i32 : i32, i32
  }
  func.func @transform_2(%arg0: i32) -> (i32, i32) {
    %c0_i32 = arith.constant 0 : i32
    %c0_i32_0 = arith.constant 0 : i32
    return %arg0, %c0_i32 : i32, i32
  }
}

</mosaic_0001>

<bundles_post_ra>
// kernel: tpu_custom_call.1
= control target key start
LH: loop header
LB: loop body
LE: loop exit
PB: predicated region body
PF: predicated region fallthrough
CT: control target
= control target key end

     0   :  { %7 = vsyncpa [#allocation3], 0  ;;  %s373_s0 = inlined_call_operand.hbm [shape: f32[64,128], index: 0, kind: input, shape index: {}]   ;;  %s374_s1 = inlined_call_operand.hbm [shape: f32[64,128], index: 1, kind: input, shape index: {}]   ;;  %s375_s2 = inlined_call_operand.hbm [shape: f32[8,128], index: 2, kind: output, shape index: {}]  }
   0x1   :  { %8 = vsyncpa [#allocation6], 0 }
   0x2   :  { %9 = vsyncpa [#allocation4], 0  ;;  %s285_s9 = smov [#allocation2]   ;;  %s213_s13 = scalar_lea.hbm %s373_s0, 1024 }
   0x3   :  { %s15_s10 = sshll.u32 %s285_s9, 4  ;;  %p214_p0 = scmp.ne.s32.totalorder %s373_s0, %s213_s13  ;;  %s16_s10 = int_to_ptr.vmem [resolvable:$true] %s15_s10 }
   0x4   :  { %p217_p1 = scmp.lt.u32.totalorder %s213_s13, %s373_s0 }
   0x6   :  { %p219_p2 = pnand %p217_p1, %p214_p0 }
   0x8   :  { %222 = shalt.err (!%p219_p2)
}
   0x9   :  { %s223_s18 = scalar_lea.vmem %s16_s10, 1024  ;;  %p228_p4 = scmp.lt.s32.totalorder %s16_s10, %s16_s10 }
   0xa   :  { %p224_p3 = scmp.ne.s32.totalorder %s16_s10, %s223_s18  ;;  %p229_p5 = scmp.lt.s32.totalorder %s223_s18, %s223_s18 }
   0xc   :  { %p230_p6 = por %p229_p5, %p228_p4 }
   0xe   :  { %p231_p7 = pnand %p230_p6, %p224_p3 }
  0x10   :  { %234 = shalt.err (!%p231_p7)
}
  0x11   :  { %s286_s19 = smov 128   ;;  %s287_s20 = smov 8  }
  0x12   :  { %21 = dma.hbm_to_vmem [thread:$0]  %s373_s0, 1024, %s16_s10, [#allocation3], %s286_s19, %s286_s19, %s287_s20  }
  0x13   :  { %s288_s23 = smov [#allocation5]   ;;  %s235_s27 = scalar_lea.hbm %s374_s1, 1024 }
  0x14   :  { %s27_s24 = sshll.u32 %s288_s23, 4  ;;  %p236_p8 = scmp.ne.s32.totalorder %s374_s1, %s235_s27  ;;  %s28_s24 = int_to_ptr.vmem [resolvable:$true] %s27_s24 }
  0x15   :  { %p239_p9 = scmp.lt.u32.totalorder %s235_s27, %s374_s1 }
  0x17   :  { %p241_p10 = pnand %p239_p9, %p236_p8 }
  0x19   :  { %244 = shalt.err (!%p241_p10)
}
  0x1a   :  { %s245_s4 = scalar_lea.vmem %s28_s24, 1024  ;;  %p250_p12 = scmp.lt.s32.totalorder %s28_s24, %s28_s24 }
  0x1b   :  { %p246_p11 = scmp.ne.s32.totalorder %s28_s24, %s245_s4  ;;  %p251_p13 = scmp.lt.s32.totalorder %s245_s4, %s245_s4 }
  0x1d   :  { %p252_p0 = por %p251_p13, %p250_p12 }
  0x1f   :  { %p253_p1 = pnand %p252_p0, %p246_p11 }
  0x21   :  { %256 = shalt.err (!%p253_p1)
}
  0x22   :  { %33 = dma.hbm_to_vmem [thread:$0]  %s374_s1, 1024, %s28_s24, [#allocation6], %s286_s19, %s286_s19, %s287_s20  }
  0x23   :  { %279 = dma.done.wait [#allocation3], 1024  }
  0x24   :  { %280 = vsyncadd [#allocation3], 4294966272 }
  0x25   :  { %281 = dma.done.wait [#allocation6], 1024  }
  0x26   :  { %282 = vsyncadd [#allocation6], 4294966272  ;;  %v40_v0 = vld [vmem:[#allocation2] sm:$0xff]  ;;  %v42_v1 = vld [vmem:[#allocation2 + $0x10] sm:$0xff]  ;;  %s289_s1 = smov [#allocation7]  }
  0x27   :  { %48 = vmax.xlane.f32.xlu0 %v40_v0  ;;  %52 = vmax.xlane.f32.xlu1 %v42_v1  ;;  %v41_v2 = vld [vmem:[#allocation2 + $0x8] sm:$0xff]  ;;  %v43_v3 = vld [vmem:[#allocation2 + $0x18] sm:$0xff]  ;;  %v44_v4 = vld [vmem:[#allocation2 + $0x20] sm:$0xff]  ;;  %s166_s6 = sshll.u32 %s289_s1, 4  ;;  %s167_s6 = int_to_ptr.vmem [resolvable:$true] %s166_s6 }
  0x28   :  { %v45_v5 = vld [vmem:[#allocation2 + $0x28] sm:$0xff]  ;;  %v46_v6 = vld [vmem:[#allocation2 + $0x30] sm:$0xff]  ;;  %v47_v7 = vld [vmem:[#allocation2 + $0x38] sm:$0xff]  ;;  %s257_s7 = scalar_lea.vmem %s167_s6, 128  ;;  %p262_p3 = scmp.lt.s32.totalorder %s167_s6, %s167_s6 }
  0x29   :  { %v128_v49 = vld [vmem:[#allocation5] sm:$0xff]  ;;  %v129_v50 = vld [vmem:[#allocation5 + $0x8] sm:$0xff]  ;;  %v130_v52 = vld [vmem:[#allocation5 + $0x10] sm:$0xff]  ;;  %p258_p2 = scmp.ne.s32.totalorder %s167_s6, %s257_s7  ;;  %p263_p4 = scmp.lt.s32.totalorder %s257_s7, %s257_s7 }
  0x2a   :  { %v136_v54 = vsub.f32 0.0, %v128_v49  ;;  %v137_v56 = vsub.f32 0.0, %v129_v50  ;;  %v131_v60 = vld [vmem:[#allocation5 + $0x18] sm:$0xff]  ;;  %v138_v62 = vsub.f32 0.0, %v130_v52 }
  0x2b   :  { %50 = vmax.xlane.f32.xlu0 %v41_v2  ;;  %54 = vmax.xlane.f32.xlu1 %v43_v3  ;;  %p264_p5 = por %p263_p4, %p262_p3 }
  0x2d   :  { %p265_p6 = pnand %p264_p5, %p258_p2 }
  0x2f   :  { %56 = vmax.xlane.f32.xlu0 %v44_v4  ;;  %58 = vmax.xlane.f32.xlu1 %v45_v5 }
  0x33   :  { %60 = vmax.xlane.f32.xlu0 %v46_v6  ;;  %62 = vmax.xlane.f32.xlu1 %v47_v7 }
  0xb4   :  { %v49_v8 = vpop.xlane.xlu0 %48  ;;  %v53_v9 = vpop.xlane.xlu1 %52 }
  0xb5   :  { %v329_v10 = vsub.f32 %v40_v0, %v49_v8  ;;  %v331_v11 = vsub.f32 %v42_v1, %v53_v9  ;;  %v132_v1 = vld [vmem:[#allocation5 + $0x20] sm:$0xff]  ;;  %v133_v8 = vld [vmem:[#allocation5 + $0x28] sm:$0xff] }
  0xb7   :  { %v72_v12 = vmul.f32 1.442695, %v329_v10  ;;  %v76_v13 = vmul.f32 1.442695, %v331_v11 }
  0xb8   :  { %v51_v14 = vpop.xlane.xlu0 %50  ;;  %v55_v15 = vpop.xlane.xlu1 %54 }
  0xb9   :  { %181 = vpow2.f32 %v72_v12  ;;  %v335_v16 = vsub.f32 %v41_v2, %v51_v14  ;;  %v337_v17 = vsub.f32 %v43_v3, %v55_v15 }
  0xba   :  { %183 = vpow2.f32 %v76_v13  ;;  %v140_v13 = vsub.f32 0.0, %v132_v1 }
  0xbb   :  { %v74_v18 = vmul.f32 1.442695, %v335_v16  ;;  %v78_v19 = vmul.f32 1.442695, %v337_v17 }
  0xbc   :  { %v57_v20 = vpop.xlane.xlu0 %56  ;;  %v59_v21 = vpop.xlane.xlu1 %58 }
  0xbd   :  { %185 = vpow2.f32 %v74_v18  ;;  %v341_v22 = vsub.f32 %v44_v4, %v57_v20  ;;  %v343_v23 = vsub.f32 %v45_v5, %v59_v21  ;;  %v139_v5 = vsub.f32 0.0, %v131_v60 }
  0xbe   :  { %187 = vpow2.f32 %v78_v19  ;;  %v141_v20 = vsub.f32 0.0, %v133_v8 }
  0xbf   :  { %v80_v24 = vmul.f32 1.442695, %v341_v22  ;;  %v82_v25 = vmul.f32 1.442695, %v343_v23 }
  0xc0   :  { %v61_v26 = vpop.xlane.xlu0 %60  ;;  %v63_v27 = vpop.xlane.xlu1 %62 }
  0xc1   :  { %189 = vpow2.f32 %v80_v24  ;;  %v347_v28 = vsub.f32 %v46_v6, %v61_v26  ;;  %v349_v29 = vsub.f32 %v47_v7, %v63_v27 }
  0xc2   :  { %191 = vpow2.f32 %v82_v25  ;;  %v135_v25 = vld [vmem:[#allocation5 + $0x38] sm:$0xff] }
  0xc3   :  { %v182_v30 = vpop.eup %181  ;;  %v84_v31 = vmul.f32 1.442695, %v347_v28  ;;  %v86_v32 = vmul.f32 1.442695, %v349_v29 }
  0xc4   :  { %88 = vadd.xlane.f32.xlu0 %v182_v30  ;;  %v184_v33 = vpop.eup %183 }
  0xc5   :  { %193 = vpow2.f32 %v84_v31 }
  0xc6   :  { %195 = vpow2.f32 %v86_v32 }
  0xc7   :  { %v186_v34 = vpop.eup %185 }
  0xc8   :  { %92 = vadd.xlane.f32.xlu0 %v184_v33  ;;  %90 = vadd.xlane.f32.xlu1 %v186_v34  ;;  %v188_v35 = vpop.eup %187 }
  0xcb   :  { %v190_v36 = vpop.eup %189 }
  0xcc   :  { %94 = vadd.xlane.f32.xlu1 %v188_v35  ;;  %96 = vadd.xlane.f32.xlu0 %v190_v36  ;;  %v192_v37 = vpop.eup %191 }
  0xcf   :  { %v194_v38 = vpop.eup %193 }
  0xd0   :  { %98 = vadd.xlane.f32.xlu1 %v192_v37  ;;  %100 = vadd.xlane.f32.xlu0 %v194_v38  ;;  %v196_v39 = vpop.eup %195 }
  0xd4   :  { %102 = vadd.xlane.f32.xlu1 %v196_v39 }
 0x151   :  { %v89_v40 = vpop.xlane.xlu0 %88 }
 0x152   :  { %197 = vlog2.f32 %v89_v40 }
 0x155   :  { %v91_v41 = vpop.xlane.xlu1 %90  ;;  %v93_v42 = vpop.xlane.xlu0 %92 }
 0x156   :  { %199 = vlog2.f32 %v91_v41 }
 0x157   :  { %201 = vlog2.f32 %v93_v42 }
 0x159   :  { %v95_v43 = vpop.xlane.xlu1 %94  ;;  %v97_v44 = vpop.xlane.xlu0 %96 }
 0x15a   :  { %203 = vlog2.f32 %v95_v43 }
 0x15b   :  { %205 = vlog2.f32 %v97_v44 }
 0x15c   :  { %v198_v45 = vpop.eup %197 }
 0x15d   :  { %v105_v46 = vmul.f32 0.6931472, %v198_v45  ;;  %v99_v47 = vpop.xlane.xlu1 %98  ;;  %v101_v48 = vpop.xlane.xlu0 %100 }
 0x15e   :  { %207 = vlog2.f32 %v99_v47 }
 0x15f   :  { %209 = vlog2.f32 %v101_v48  ;;  %v120_v55 = vsub.f32 %v329_v10, %v105_v46 }
 0x160   :  { %v200_v51 = vpop.eup %199 }
 0x161   :  { %v202_v53 = vpop.eup %201  ;;  %v107_v57 = vmul.f32 0.6931472, %v200_v51  ;;  %v103_v58 = vpop.xlane.xlu1 %102  ;;  %v144_v3 = vmul.f32 %v136_v54, %v120_v55 }
 0x162   :  { %v109_v59 = vmul.f32 0.6931472, %v202_v53  ;;  %211 = vlog2.f32 %v103_v58 }
 0x163   :  { %v121_v61 = vsub.f32 %v335_v16, %v107_v57  ;;  %v134_v16 = vld [vmem:[#allocation5 + $0x30] sm:$0xff] }
 0x164   :  { %v204_v63 = vpop.eup %203  ;;  %v122_v0 = vsub.f32 %v331_v11, %v109_v59  ;;  %v142_v31 = vsub.f32 0.0, %v134_v16 }
 0x165   :  { %v206_v2 = vpop.eup %205  ;;  %v145_v4 = vmul.f32 %v137_v56, %v121_v61  ;;  %v111_v6 = vmul.f32 0.6931472, %v204_v63 }
 0x166   :  { %v113_v7 = vmul.f32 0.6931472, %v206_v2  ;;  %v146_v10 = vmul.f32 %v138_v62, %v122_v0 }
 0x167   :  { %v152_v9 = vadd.f32 %v145_v4, %v144_v3  ;;  %v123_v12 = vsub.f32 %v337_v17, %v111_v6 }
 0x168   :  { %v208_v14 = vpop.eup %207  ;;  %v124_v15 = vsub.f32 %v341_v22, %v113_v7  ;;  %v143_v22 = vsub.f32 0.0, %v135_v25 }
 0x169   :  { %v210_v18 = vpop.eup %209  ;;  %v153_v19 = vadd.f32 %v152_v9, %v146_v10  ;;  %v147_v11 = vmul.f32 %v139_v5, %v123_v12  ;;  %v115_v21 = vmul.f32 0.6931472, %v208_v14 }
 0x16a   :  { %v117_v24 = vmul.f32 0.6931472, %v210_v18  ;;  %v148_v27 = vmul.f32 %v140_v13, %v124_v15 }
 0x16b   :  { %v154_v26 = vadd.f32 %v153_v19, %v147_v11  ;;  %v125_v30 = vsub.f32 %v343_v23, %v115_v21 }
 0x16c   :  { %v212_v32 = vpop.eup %211  ;;  %v126_v17 = vsub.f32 %v347_v28, %v117_v24 }
 0x16d   :  { %v155_v33 = vadd.f32 %v154_v26, %v148_v27  ;;  %v149_v34 = vmul.f32 %v141_v20, %v125_v30  ;;  %v119_v35 = vmul.f32 0.6931472, %v212_v32 }
 0x16e   :  { %v150_v36 = vmul.f32 %v142_v31, %v126_v17 }
 0x16f   :  { %v127_v37 = vsub.f32 %v349_v29, %v119_v35  ;;  %v156_v38 = vadd.f32 %v155_v33, %v149_v34 }
 0x171   :  { %v151_v39 = vmul.f32 %v143_v22, %v127_v37  ;;  %v157_v40 = vadd.f32 %v156_v38, %v150_v36 }
 0x173   :  { %v158_v41 = vadd.f32 %v157_v40, %v151_v39 }
 0x175   :  { %159 = vst [vmem:[#allocation7] sm:$0xff] %v158_v41 }
 0x176   :  { %268 = shalt.err (!%p265_p6)
}
 0x177   :  { %s269_s10 = scalar_lea.hbm %s375_s2, 128 }
 0x178   :  { %p270_p7 = scmp.ne.s32.totalorder %s375_s2, %s269_s10  ;;  %p273_p8 = scmp.lt.u32.totalorder %s269_s10, %s375_s2 }
 0x17a   :  { %p275_p9 = pnand %p273_p8, %p270_p7 }
 0x17c   :  { %278 = shalt.err (!%p275_p9)
}
 0x17d   :  { %169 = dma.vmem_to_hbm [thread:$0]  %s167_s6, 128, %s375_s2, [#allocation4]  }
 0x17e   :  { %283 = dma.done.wait [#allocation4], 128  }
 0x17f   :  { %284 = vsyncadd [#allocation4], 4294967168 }
 0x180   :  { %173 = vsyncpa [#allocation3], 1 }
 0x181   :  { %174 = vsyncpa [#allocation6], 1 }
 0x182   :  { %175 = vsyncpa [#allocation4], 1 }

</bundles_post_ra>
